<compile_context>
chip_gen: v5e
topology: v5e:2x2
jax: 0.10.0
libtpu: 0.0.40
codegen_flags: <defaults>
</compile_context>

<pallas_src>
import functools

import jax
import jax.numpy as jnp
from jax.experimental import pallas as pl
from jax.experimental.pallas import tpu as pltpu


# Minimal stand-in for transformers.get_activation(act).
_ACTIVATIONS = {
    "relu": lambda h: jnp.maximum(h, 0.0),
    "gelu": functools.partial(jax.nn.gelu, approximate=False),      # exact erf GELU
    "gelu_new": functools.partial(jax.nn.gelu, approximate=True),   # tanh approx
    "silu": jax.nn.silu,
    "swish": jax.nn.silu,
    "tanh": jnp.tanh,
}


def _adapter_fwd_kernel(x_ref, a_ref, b_ref, res_ref, o_ref, *, act_fn):
    # x_ref: (tm, D) io dtype, a_ref: (D, r), b_ref: (r, D), res_ref: (tm, D)
    # Matmuls accumulate in f32 (MXU), residual add in f32, cast only on store.
    h = jnp.dot(x_ref[...], a_ref[...], preferred_element_type=jnp.float32)
    h = act_fn(h)
    y = jnp.dot(h.astype(b_ref.dtype), b_ref[...],
                preferred_element_type=jnp.float32)
    o_ref[...] = (y + res_ref[...].astype(jnp.float32)).astype(o_ref.dtype)


def _device_kind():
    try:
        return jax.devices()[0].device_kind.lower()
    except Exception:  # pragma: no cover - defensive; never expected on TPU
        return ""


def _pick_tm(M, D, itemsize, kind):
    """Token-tile size: large (mem-bound), VMEM-safe, generation-aware."""
    is_v7 = "v7" in kind
    two_tc = is_v7 or ("v4" in kind) or ("v5p" in kind)

    # Big tiles amortize the ~0.35us/step pipeline overhead; v7x gets the
    # largest since its 3.2 TB/s HBM makes per-step DMA very short.
    requested = 2048 if is_v7 else 1024
    # Stream working set (x, res, out) double-buffered; tighter on v7x (64 MiB/TC).
    budget = (24 << 20) if is_v7 else (32 << 20)
    cap = max(8, budget // (6 * D * itemsize))
    tm = max(8, (min(requested, cap) // 8) * 8)

    m_pad8 = ((M + 7) // 8) * 8
    tm = max(8, (min(tm, m_pad8) // 8) * 8)

    # 2-TC chips: aim for >= 2 blocks per TensorCore (>= 4 grid steps) when
    # there are enough rows; single-TC chips never split a single-tile problem.
    if two_tc and m_pad8 >= 4 * 8:
        tm_target = max(8, ((m_pad8 // 4) // 8) * 8)
        tm = min(tm, tm_target)
    return tm


@functools.partial(jax.jit,
                   static_argnames=("dim", "r", "act", "tm"),
                   donate_argnames=("residual",))
def intrinsic_adapter_forward(x, residual, share_intrinsic, hyper_A, hyper_B,
                              *, dim, r, act="relu", tm=None):
    intrinsic_dim = share_intrinsic.shape[0]
    assert hyper_A.shape == (intrinsic_dim, dim * r)
    assert hyper_B.shape == (intrinsic_dim, r * dim)

    B, S, D = x.shape
    assert D == dim
    M = B * S

    io_dtype = x.dtype
    out_dtype = jnp.promote_types(x.dtype, residual.dtype)
    x_itemsize = jnp.dtype(io_dtype).itemsize
    out_itemsize = jnp.dtype(out_dtype).itemsize
    act_fn = _ACTIVATIONS[act]

    kind = _device_kind()
    if tm is None:
        tm = _pick_tm(M, D, x_itemsize, kind)

    # --- Adapter weight generation: tiny 1 x intrinsic_dim GEMV, left to XLA ---
    # TODO(synk): cache adapter_A/adapter_B across forwards when the hyper
    # parameters are unchanged (matters for decode-style tiny M).
    s_row = share_intrinsic.reshape(1, intrinsic_dim).astype(jnp.float32)
    adapter_A = (s_row @ hyper_A.astype(jnp.float32)).reshape(dim, r).astype(io_dtype)
    adapter_B = (s_row @ hyper_B.astype(jnp.float32)).reshape(r, dim).astype(io_dtype)

    # --- Token hot path: matmul -> act -> matmul -> residual add ---
    xf = x.reshape(M, D)
    rf = residual.reshape(M, D).astype(out_dtype)   # up-cast only (no precision loss)

    # Ragged M: no padding / slicing — Pallas masks the partial last block.
    grid = (pl.cdiv(M, tm),)

    # Need-based scoped-VMEM limit with ~8 MiB headroom; lower cap on v7x
    # (64 MiB per-TC physical VMEM).
    stream_bytes = 2 * tm * D * (x_itemsize + 2 * out_itemsize)   # double-buffered x/res/out
    weight_bytes = 2 * 2 * dim * r * x_itemsize
    vmem_cap = (48 << 20) if "v7" in kind else (96 << 20)
    vmem_limit = int(min(max(stream_bytes + weight_bytes + (8 << 20), 16 << 20),
                         vmem_cap))

    # NOTE: for production dims (T5: 512/768/1024) the output last dim is a
    # multiple of 128 -> lane-dense unmasked stores. The toy dim=32 below relies
    # on the full-array-dim exception and uses masked stores (fine for a test).
    out = pl.pallas_call(
        functools.partial(_adapter_fwd_kernel, act_fn=act_fn),
        out_shape=jax.ShapeDtypeStruct((M, D), out_dtype),
        grid=grid,
        in_specs=[
            pl.BlockSpec((tm, D), lambda i: (i, 0)),
            pl.BlockSpec((D, r), lambda i: (0, 0)),
            pl.BlockSpec((r, D), lambda i: (0, 0)),
            pl.BlockSpec((tm, D), lambda i: (i, 0)),
        ],
        out_specs=pl.BlockSpec((tm, D), lambda i: (i, 0)),
        input_output_aliases={3: 0},  # residual buffer reused for the output
        compiler_params=pltpu.CompilerParams(
            dimension_semantics=("parallel",),
            vmem_limit_bytes=vmem_limit,
        ),
    )(xf, adapter_A, adapter_B, rf)

    return out.reshape(B, S, D)


if __name__ == "__main__":
    # Module hyper-params (small, consistent with __init__ shapes).
    intrinsic_dim, dim, r = 8, 32, 4
    B, S = 2, 8

    key = jax.random.PRNGKey(0)
    k_ha, k_hb, k_si, k_x, k_res = jax.random.split(key, 5)

    # normal(mean=0, std=0.02) like reset_parameters().
    hyper_A = 0.02 * jax.random.normal(k_ha, (intrinsic_dim, dim * r), jnp.float32)
    hyper_B = 0.02 * jax.random.normal(k_hb, (intrinsic_dim, r * dim), jnp.float32)
    share_intrinsic = jax.random.normal(k_si, (intrinsic_dim, 1), jnp.float32)

    x = jax.random.normal(k_x, (B, S, dim), jnp.float32)
    residual = jax.random.normal(k_res, (B, S, dim), jnp.float32)

    # Pure-JAX f32 reference (same math as the PyTorch forward, act = relu).
    adapter_A_ref = (share_intrinsic.T @ hyper_A).reshape(dim, r)
    adapter_B_ref = (share_intrinsic.T @ hyper_B).reshape(r, dim)
    ref_f32 = jnp.maximum(x @ adapter_A_ref, 0.0) @ adapter_B_ref + residual

    # bf16 inputs + reference, prepared BEFORE the f32 call (residual is donated).
    xb = x.astype(jnp.bfloat16)
    rb = residual.astype(jnp.bfloat16)
    Ab = adapter_A_ref.astype(jnp.bfloat16).astype(jnp.float32)
    Bb = adapter_B_ref.astype(jnp.bfloat16).astype(jnp.float32)
    ref_bf16 = (jnp.maximum(xb.astype(jnp.float32) @ Ab, 0.0) @ Bb
                + rb.astype(jnp.float32))
    ref_bf16 = jax.block_until_ready(ref_bf16)

    # --- f32 I/O path (tight check); residual is donated into the output ---
    out_f32 = intrinsic_adapter_forward(
        x, residual, share_intrinsic, hyper_A, hyper_B, dim=dim, r=r, act="relu")
    out_f32 = jax.block_until_ready(out_f32)
    assert jnp.allclose(out_f32, ref_f32, atol=1e-4, rtol=1e-4), "f32 mismatch"

    # --- bf16 I/O path (streams half the bytes; f32 accumulation inside) ---
    out_bf16 = intrinsic_adapter_forward(
        xb, rb, share_intrinsic, hyper_A, hyper_B, dim=dim, r=r, act="relu")
    out_bf16 = jax.block_until_ready(out_bf16)
    assert jnp.allclose(out_bf16.astype(jnp.float32), ref_bf16,
                        atol=3e-2, rtol=3e-2), "bf16 mismatch"

    print("KERNEL_OK")
</pallas_src>

<mosaic_0001>
module attributes {stable_mosaic.version = 11 : i64} {
  func.func @_adapter_fwd_kernel(%arg0: i32, %arg1: memref<16x32xf32, #tpu.memory_space<vmem>>, %arg2: memref<32x4xf32, #tpu.memory_space<vmem>>, %arg3: memref<4x32xf32, #tpu.memory_space<vmem>>, %arg4: memref<16x32xf32, #tpu.memory_space<vmem>>, %arg5: memref<16x32xf32, #tpu.memory_space<vmem>>) attributes {dimension_semantics = [#tpu.dimension_semantics<parallel>], iteration_bounds = array<i64: 1>, scalar_prefetch = 0 : i64, scratch_operands = 0 : i64, tpu.core_type = #tpu.core_type<tc>, window_params = [{transform_indices = @transform_0, window_bounds = array<i64: 16, 32>}, {pipeline_mode = #tpu.pipeline_mode<synchronous>, transform_indices = @transform_1, window_bounds = array<i64: 32, 4>}, {pipeline_mode = #tpu.pipeline_mode<synchronous>, transform_indices = @transform_2, window_bounds = array<i64: 4, 32>}, {transform_indices = @transform_3, window_bounds = array<i64: 16, 32>}, {transform_indices = @transform_4, window_bounds = array<i64: 16, 32>}]} {
    %c0 = arith.constant 0 : index
    %c0_0 = arith.constant 0 : index
    %0 = vector.load %arg1[%c0, %c0_0] : memref<16x32xf32, #tpu.memory_space<vmem>>, vector<16x32xf32>
    %c0_1 = arith.constant 0 : index
    %c0_2 = arith.constant 0 : index
    %1 = vector.load %arg2[%c0_1, %c0_2] : memref<32x4xf32, #tpu.memory_space<vmem>>, vector<32x4xf32>
    %cst = arith.constant dense<0.000000e+00> : vector<16x4xf32>
    %2 = tpu.matmul %0, %1, %cst {dimension_numbers = #tpu.dot_dimension_numbers<[1], [0], [0], [1], [0, 0, 1, 1], [], []>} : vector<16x32xf32>, vector<32x4xf32>, vector<16x4xf32> -> vector<16x4xf32>
    %cst_3 = arith.constant 0.000000e+00 : f32
    %3 = vector.broadcast %cst_3 : f32 to vector<16x4xf32>
    %4 = arith.maximumf %2, %3 : vector<16x4xf32>
    %c0_4 = arith.constant 0 : index
    %c0_5 = arith.constant 0 : index
    %5 = vector.load %arg3[%c0_4, %c0_5] : memref<4x32xf32, #tpu.memory_space<vmem>>, vector<4x32xf32>
    %cst_6 = arith.constant dense<0.000000e+00> : vector<16x32xf32>
    %6 = tpu.matmul %4, %5, %cst_6 {dimension_numbers = #tpu.dot_dimension_numbers<[1], [0], [0], [1], [0, 0, 1, 1], [], []>} : vector<16x4xf32>, vector<4x32xf32>, vector<16x32xf32> -> vector<16x32xf32>
    %c0_7 = arith.constant 0 : index
    %c0_8 = arith.constant 0 : index
    %7 = vector.load %arg4[%c0_7, %c0_8] : memref<16x32xf32, #tpu.memory_space<vmem>>, vector<16x32xf32>
    %8 = arith.addf %6, %7 : vector<16x32xf32>
    %c0_9 = arith.constant 0 : index
    %c0_10 = arith.constant 0 : index
    %9 = vector.load %arg5[%c0_9, %c0_10] : memref<16x32xf32, #tpu.memory_space<vmem>>, vector<16x32xf32>
    tpu.vector_store %arg5[%c0_9, %c0_10], %8 {strides = array<i32>} : memref<16x32xf32, #tpu.memory_space<vmem>>, vector<16x32xf32>,
    return
  }
  func.func @transform_0(%arg0: i32) -> (i32, i32) {
    %c0_i32 = arith.constant 0 : i32
    %c0_i32_0 = arith.constant 0 : i32
    return %arg0, %c0_i32 : i32, i32
  }
  func.func @transform_1(%arg0: i32) -> (i32, i32) {
    %c0_i32 = arith.constant 0 : i32
    %c0_i32_0 = arith.constant 0 : i32
    %c0_i32_1 = arith.constant 0 : i32
    return %c0_i32, %c0_i32_0 : i32, i32
  }
  func.func @transform_2(%arg0: i32) -> (i32, i32) {
    %c0_i32 = arith.constant 0 : i32
    %c0_i32_0 = arith.constant 0 : i32
    %c0_i32_1 = arith.constant 0 : i32
    return %c0_i32, %c0_i32_0 : i32, i32
  }
  func.func @transform_3(%arg0: i32) -> (i32, i32) {
    %c0_i32 = arith.constant 0 : i32
    %c0_i32_0 = arith.constant 0 : i32
    return %arg0, %c0_i32 : i32, i32
  }
  func.func @transform_4(%arg0: i32) -> (i32, i32) {
    %c0_i32 = arith.constant 0 : i32
    %c0_i32_0 = arith.constant 0 : i32
    return %arg0, %c0_i32 : i32, i32
  }
}

</mosaic_0001>

<bundles_post_ra>
// kernel: intrinsic_adapter_forward.1
= control target key start
LH: loop header
LB: loop body
LE: loop exit
PB: predicated region body
PF: predicated region fallthrough
CT: control target
= control target key end

     0   :  { %vm23_vm0 = vcmask 261120   ;;  %vm65_vm1 = vcmask 1043456   ;;  %vm58_vm2 = vcmask 31744   ;;  %s170_s1 = inlined_call_operand.vmem [shape: f32[32,4], index: 1, kind: input, shape index: {}]   ;;  %s171_s0 = inlined_call_operand.vmem [shape: f32[16,32], index: 0, kind: input, shape index: {}]   ;;  %s172_s2 = inlined_call_operand.vmem [shape: f32[4,32], index: 2, kind: input, shape index: {}]   ;;  %s173_s3 = inlined_call_operand.vmem [shape: f32[16,32], index: 3, kind: input, shape index: {}, may-alias: {3,4}]   ;;  %s174_s4 = inlined_call_operand.vmem [shape: f32[16,32], index: 4, kind: output, shape index: {}, may-alias: {3,4}]  }
   0x1   :  { %v22_v0 = vld [vmem:[%s170_s1 + $0x18] sm:$0xff]  ;;  %v21_v1 = vld [vmem:[%s170_s1 + $0x10] sm:$0xff]  ;;  %v20_v2 = vld [vmem:[%s170_s1 + $0x8] sm:$0xff] }
   0x2   :  { %103 = vmatpush.msra.mxu2 %v22_v0  ;;  %42 = vmatpush.msra.mxu0 %v22_v0  ;;  %v19_v3 = vld [vmem:[%s170_s1] sm:$0xff]  ;;  %v18_v4 = vld [vmem:[%s171_s0 + $0x8] sm:$0xff] }
   0x3   :  { %v17_v5 = vld [vmem:[%s171_s0] sm:$0xff] }
   0x4   :  { %104 = vmatpush.msra.mxu2 %v21_v1  ;;  %43 = vmatpush.msra.mxu0 %v21_v1  ;;  %v55_v6 = vld [vmem:[%s172_s2] sm:$0xf] }
   0x5   :  { %107 = vmatpush.msk.msra.mxu3 %vm65_vm1, %v55_v6  ;;  %100 = vmatpush.msk.msra.mxu1 %vm65_vm1, %v55_v6  ;;  %v56_v11 = vld [vmem:[%s173_s3] sm:$0xff] }
   0x6   :  { %105 = vmatpush.msra.mxu2 %v20_v2  ;;  %44 = vmatpush.msra.mxu0 %v20_v2 }
   0x8   :  { %106 = vmatpush.msra.mxu2 %v19_v3  ;;  %45 = vmatpush.msra.mxu0 %v19_v3 }
   0x9   :  { %99 = vmatmul.msk.f32.vlgmr.msra.gmra.mxu2 %vm23_vm0, %v18_v4  ;;  %98 = vmatmul.msk.f32.vlgmr.msra.gmra.mxu0 %vm23_vm0, %v17_v5 }
  0x86   :  { %v47_v7 = vpop.f32.mrf.mxu0 }
  0x87   :  { %v53_v8 = vmax.f32 %v47_v7, 0.0 }
  0x89   :  { %101 = vmatmul.msk.f32.vlgmr.msra.gmra.mxu1 %vm58_vm2, %v53_v8 }
  0x8c   :  { %v50_v9 = vpop.f32.mrf.mxu2 }
  0x8d   :  { %v54_v10 = vmax.f32 %v50_v9, 0.0 }
  0x8f   :  { %102 = vmatmul.msk.f32.vlgmr.msra.gmra.mxu3 %vm58_vm2, %v54_v10 }
 0x106   :  { %v86_v12 = vpop.f32.mrf.mxu1 }
 0x107   :  { %v87_v13 = vadd.f32 %v86_v12, %v56_v11 }
 0x109   :  { %92 = vst.msk [vmem:[%s174_s4] sm:$0xff] %vm23_vm0, %v87_v13 }
 0x110   :  { %v57_v14 = vld [vmem:[%s173_s3 + $0x8] sm:$0xff] }
 0x112   :  { %v89_v15 = vpop.f32.mrf.mxu3 }
 0x113   :  { %v90_v16 = vadd.f32 %v89_v15, %v57_v14 }
 0x115   :  { %93 = vst.msk [vmem:[%s174_s4 + $0x8] sm:$0xff] %vm23_vm0, %v90_v16 }

</bundles_post_ra>
